<compile_context>
chip_gen: v5e
topology: v5e:2x2
jax: 0.10.0
libtpu: 0.0.40
codegen_flags: <defaults>
</compile_context>

<pallas_src>
import numpy as np
import jax
import jax.numpy as jnp
from jax.experimental import pallas as pl
from jax.experimental.pallas import tpu as pltpu


def _round_up(n, m):
    return ((n + m - 1) // m) * m


# ---------------------------------------------------------------------------
# Pallas kernel: one batch tile of the folded affine chain = matmul + bias.
# ---------------------------------------------------------------------------
def sds_kernel(x_ref, w_ref, b_ref, o_ref):
    # bf16 x bf16 -> f32 accumulate on the MXU (no in-kernel operand casts).
    acc = jnp.dot(x_ref[...], w_ref[...], preferred_element_type=jnp.float32)
    o_ref[...] = (acc + b_ref[...]).astype(o_ref.dtype)   # f32 epilogue on VPU


def selection_down_sampling(x, w_fold, b_fold, out_size, *, tb=256):
    """x: (B, L, C) -> (B, out_size, C) using the pre-folded affine operator.

    w_fold: (LC_pad, OC_pad) bf16,  b_fold: (1, OC_pad) f32,
    with LC_pad = round_up(L*C, 128) and OC_pad = round_up(out_size*C, 128).
    """
    B, L, C = x.shape
    LCp, OCp = w_fold.shape
    LC = L * C
    OC = out_size * C
    assert LCp >= LC and OCp >= OC and OCp % 128 == 0

    # Batch tile: multiple of 8 sublanes; 256 matches the v6e 256-wide MXU and
    # keeps per-step VMEM (~0.6 MiB double-buffered) far below the v7x limit.
    TB = min(tb, _round_up(B, 8))
    B_pad = _round_up(B, TB)

    # Flatten (L, C) into lanes (same row-major layout used to build w_fold),
    # cast once to bf16 (native MXU operand dtype) and zero-pad batch / K dims.
    x_flat = x.reshape(B, LC).astype(w_fold.dtype)
    if B_pad != B or LCp != LC:
        x_flat = jnp.pad(x_flat, ((0, B_pad - B), (0, LCp - LC)))

    y_flat = pl.pallas_call(
        sds_kernel,
        out_shape=jax.ShapeDtypeStruct((B_pad, OCp), jnp.float32),
        grid=(B_pad // TB,),
        in_specs=[
            pl.BlockSpec((TB, LCp), lambda i: (i, 0)),    # activation batch tile
            pl.BlockSpec((LCp, OCp), lambda i: (0, 0)),   # weight slab, VMEM-resident
            pl.BlockSpec((1, OCp), lambda i: (0, 0)),     # bias row,   VMEM-resident
        ],
        out_specs=pl.BlockSpec((TB, OCp), lambda i: (i, 0)),
        compiler_params=pltpu.CompilerParams(
            dimension_semantics=("parallel",)),
    )(x_flat, w_fold, b_fold)

    return y_flat[:B, :OC].reshape(B, out_size, C)


# ---------------------------------------------------------------------------
# Plain-JAX glue: parameter init, one-time operator folding, reference.
# ---------------------------------------------------------------------------
def init_params(key, in_c):
    def conv_init(kw, kb, k):
        bound = 1.0 / float(np.sqrt(in_c * k))
        w = jax.random.uniform(kw, (in_c, in_c, k), jnp.float32, -bound, bound)
        b = jax.random.uniform(kb, (in_c,), jnp.float32, -bound, bound)
        return w, b

    ks = jax.random.split(key, 10)
    w1, b1 = conv_init(ks[0], ks[1], 3)
    w2, b2 = conv_init(ks[2], ks[3], 3)   # the k=3 conv2 (the k=2 one is shadowed)
    w3, b3 = conv_init(ks[4], ks[5], 3)
    w4, b4 = conv_init(ks[6], ks[7], 2)
    w21, b21 = conv_init(ks[8], ks[9], 2)
    return dict(w1=w1, b1=b1, w2=w2, b2=b2, w3=w3, b3=b3,
                w4=w4, b4=b4, w21=w21, b21=b21)


def _linear_chain(x_ncl, params, out_size, use_bias):
    """The module's forward on (N, C, L) data, optionally without biases."""
    def conv(h, w, b):
        y = jax.lax.conv_general_dilated(
            h, w, window_strides=(1,), padding="VALID",
            dimension_numbers=("NCH", "OIH", "NCH"))
        return y + b[None, :, None] if use_bias else y

    def avg(h):                                   # AvgPool1d(2): floor on odd L
        N, Cc, Ll = h.shape
        Lo = Ll // 2
        return h[..., :2 * Lo].reshape(N, Cc, Lo, 2).mean(-1)

    h = avg(conv(conv(x_ncl, params["w1"], params["b1"]),
                 params["w2"], params["b2"]))
    h = avg(conv(conv(h, params["w3"], params["b3"]),
                 params["w4"], params["b4"]))
    h = avg(conv(conv(h, params["w2"], params["b2"]),    # conv2 weights reused
                 params["w21"], params["b21"]))
    Lin = h.shape[-1]
    # PyTorch nn.Upsample(size=out, mode='nearest'): src = floor(i*Lin/out), clamped
    src = np.minimum(np.floor(np.arange(out_size) * (Lin / out_size)).astype(np.int64),
                     Lin - 1)
    return h[..., src]                                   # (N, C, out)


def fold_params(params, L, C, out_size):
    """One-time fold of the full affine forward into a lane-padded
    (LC_pad, OC_pad) bf16 weight and (1, OC_pad) f32 bias (NLC flattening)."""
    LC = L * C
    OC = out_size * C
    LCp = _round_up(LC, 128)
    OCp = _round_up(OC, 128)

    basis = jnp.eye(LC, dtype=jnp.float32).reshape(LC, L, C)
    basis_ncl = jnp.transpose(basis, (0, 2, 1))                     # (LC, C, L)
    M = _linear_chain(basis_ncl, params, out_size, use_bias=False)  # (LC, C, out)
    M = jnp.transpose(M, (0, 2, 1)).reshape(LC, OC)
    bias = _linear_chain(jnp.zeros((1, C, L), jnp.float32),
                         params, out_size, use_bias=True)           # (1, C, out)
    bias = jnp.transpose(bias, (0, 2, 1)).reshape(1, OC)

    # Zero-pad K and N to lane multiples (unmasked loads/stores, dense MXU
    # packing) and store the weight as bf16; the bias stays f32.
    M = jnp.pad(M, ((0, LCp - LC), (0, OCp - OC))).astype(jnp.bfloat16)
    bias = jnp.pad(bias, ((0, 0), (0, OCp - OC)))
    return M, bias


def ref_forward(x, params, out_size):
    """Direct (unfolded) f32 reference for correctness: (B, L, C) -> (B, out, C)."""
    h = _linear_chain(jnp.transpose(x, (0, 2, 1)), params, out_size, use_bias=True)
    return jnp.transpose(h, (0, 2, 1))


if __name__ == "__main__":
    B, L, C, OUT = 2, 64, 4, 8   # in_c=4, Upsample target size=8
    key = jax.random.PRNGKey(0)
    kx, kp = jax.random.split(key)
    x = jax.random.normal(kx, (B, L, C), jnp.float32)
    params = init_params(kp, C)

    # one-time parameter preprocessing (depends only on params / static shapes)
    w_fold, b_fold = fold_params(params, L, C, OUT)

    y = selection_down_sampling(x, w_fold, b_fold, OUT)
    y = jax.block_until_ready(y)

    y_ref = ref_forward(x, params, OUT)
    assert y.shape == (B, OUT, C), y.shape
    # bf16 operands with f32 accumulation -> slightly looser tolerance than f32.
    np.testing.assert_allclose(np.asarray(y), np.asarray(y_ref),
                               rtol=2e-2, atol=2e-2)
    print("KERNEL_OK")
</pallas_src>

<mosaic_0001>
module attributes {stable_mosaic.version = 11 : i64} {
  func.func @sds_kernel(%arg0: i32, %arg1: memref<8x256xbf16, #tpu.memory_space<vmem>>, %arg2: memref<256x128xbf16, #tpu.memory_space<vmem>>, %arg3: memref<1x128xf32, #tpu.memory_space<vmem>>, %arg4: memref<8x128xf32, #tpu.memory_space<vmem>>) attributes {dimension_semantics = [#tpu.dimension_semantics<parallel>], iteration_bounds = array<i64: 1>, scalar_prefetch = 0 : i64, scratch_operands = 0 : i64, tpu.core_type = #tpu.core_type<tc>, window_params = [{transform_indices = @transform_0, window_bounds = array<i64: 8, 256>}, {pipeline_mode = #tpu.pipeline_mode<synchronous>, transform_indices = @transform_1, window_bounds = array<i64: 256, 128>}, {pipeline_mode = #tpu.pipeline_mode<synchronous>, transform_indices = @transform_2, window_bounds = array<i64: 1, 128>}, {transform_indices = @transform_3, window_bounds = array<i64: 8, 128>}]} {
    %c0 = arith.constant 0 : index
    %c0_0 = arith.constant 0 : index
    %0 = vector.load %arg1[%c0, %c0_0] : memref<8x256xbf16, #tpu.memory_space<vmem>>, vector<8x256xbf16>
    %c0_1 = arith.constant 0 : index
    %c0_2 = arith.constant 0 : index
    %1 = vector.load %arg2[%c0_1, %c0_2] : memref<256x128xbf16, #tpu.memory_space<vmem>>, vector<256x128xbf16>
    %cst = arith.constant dense<0.000000e+00> : vector<8x128xf32>
    %2 = tpu.matmul %0, %1, %cst {dimension_numbers = #tpu.dot_dimension_numbers<[1], [0], [0], [1], [0, 0, 1, 1], [], []>} : vector<8x256xbf16>, vector<256x128xbf16>, vector<8x128xf32> -> vector<8x128xf32>
    %c0_3 = arith.constant 0 : index
    %c0_4 = arith.constant 0 : index
    %3 = vector.load %arg3[%c0_3, %c0_4] : memref<1x128xf32, #tpu.memory_space<vmem>>, vector<1x128xf32>
    %4 = vector.broadcast %3 : vector<1x128xf32> to vector<8x128xf32>
    %5 = arith.addf %2, %4 : vector<8x128xf32>
    %c0_5 = arith.constant 0 : index
    %c0_6 = arith.constant 0 : index
    %6 = vector.load %arg4[%c0_5, %c0_6] : memref<8x128xf32, #tpu.memory_space<vmem>>, vector<8x128xf32>
    tpu.vector_store %arg4[%c0_5, %c0_6], %5 {strides = array<i32>} : memref<8x128xf32, #tpu.memory_space<vmem>>, vector<8x128xf32>,
    return
  }
  func.func @transform_0(%arg0: i32) -> (i32, i32) {
    %c0_i32 = arith.constant 0 : i32
    %c0_i32_0 = arith.constant 0 : i32
    return %arg0, %c0_i32 : i32, i32
  }
  func.func @transform_1(%arg0: i32) -> (i32, i32) {
    %c0_i32 = arith.constant 0 : i32
    %c0_i32_0 = arith.constant 0 : i32
    %c0_i32_1 = arith.constant 0 : i32
    return %c0_i32, %c0_i32_0 : i32, i32
  }
  func.func @transform_2(%arg0: i32) -> (i32, i32) {
    %c0_i32 = arith.constant 0 : i32
    %c0_i32_0 = arith.constant 0 : i32
    %c0_i32_1 = arith.constant 0 : i32
    return %c0_i32, %c0_i32_0 : i32, i32
  }
  func.func @transform_3(%arg0: i32) -> (i32, i32) {
    %c0_i32 = arith.constant 0 : i32
    %c0_i32_0 = arith.constant 0 : i32
    return %arg0, %c0_i32 : i32, i32
  }
}

</mosaic_0001>

<bundles_post_ra>
// kernel: tpu_custom_call.1
= control target key start
LH: loop header
LB: loop body
LE: loop exit
PB: predicated region body
PF: predicated region fallthrough
CT: control target
= control target key end

     0   :  { %8 = vsyncpa [#allocation3], 0  ;;  %s431_s0 = inlined_call_operand.hbm [shape: bf16[8,256], index: 0, kind: input, shape index: {}]   ;;  %s432_s1 = inlined_call_operand.hbm [shape: bf16[256,128], index: 1, kind: input, shape index: {}]   ;;  %s433_s2 = inlined_call_operand.vmem [shape: f32[1,128], index: 2, kind: input, shape index: {}]   ;;  %s434_s3 = inlined_call_operand.hbm [shape: f32[8,128], index: 3, kind: output, shape index: {}]  }
   0x1   :  { %9 = vsyncpa [#allocation6], 0 }
   0x2   :  { %10 = vsyncpa [#allocation4], 0  ;;  %s16_s14 = sshll.u32 %s431_s0, 4  ;;  %s394_s15 = smov [#allocation2]   ;;  %s17_s14 = int_to_ptr.hbm [resolvable:$true] %s16_s14 }
   0x3   :  { %s18_s16 = sshll.u32 %s394_s15, 4  ;;  %s26_s19 = sshll.u32 %s432_s1, 4  ;;  %s19_s16 = int_to_ptr.vmem [resolvable:$true] %s18_s16  ;;  %s27_s19 = int_to_ptr.hbm [resolvable:$true] %s26_s19 }
   0x4   :  { %21 = dma.hbm_to_vmem [thread:$0]  %s17_s14, 128, %s19_s16, [#allocation3]  }
   0x5   :  { %s395_s20 = smov [#allocation5]   ;;  %s396_s22 = smov 64  }
   0x6   :  { %s28_s21 = sshll.u32 %s395_s20, 4  ;;  %s397_s23 = smov 4   ;;  %s29_s21 = int_to_ptr.vmem [resolvable:$true] %s28_s21 }
   0x7   :  { %34 = dma.hbm_to_vmem [thread:$0]  %s27_s19, 2048, %s29_s21, [#allocation6], %s396_s22, %s396_s22, %s397_s23  }
   0x8   :  { %388 = dma.done.wait [#allocation3], 128  }
   0x9   :  { %389 = vsyncadd [#allocation3], 4294967168 }
   0xa   :  { %390 = dma.done.wait [#allocation6], 2048  }
   0xb   :  { %391 = vsyncadd [#allocation6], 4294965248  ;;  %v301_v0 = vld [vmem:[#allocation5 + $0x38] sm:$0xff]  ;;  %v300_v2 = vld [vmem:[#allocation5 + $0x30] sm:$0xff]  ;;  %s398_s24 = smov [#allocation7]   ;;  %s219_s28 = sshll.u32 %s434_s3, 4  ;;  %s220_s28 = int_to_ptr.hbm [resolvable:$true] %s219_s28 }
   0xc   :  { %v309_v1 = vld [vmem:[#allocation5 + $0x78] sm:$0xff]  ;;  %185 = vmatpush.bf16.msra.mxu0 %v301_v0  ;;  %v308_v3 = vld [vmem:[#allocation5 + $0x70] sm:$0xff]  ;;  %v299_v4 = vld [vmem:[#allocation5 + $0x28] sm:$0xff]  ;;  %s217_s25 = sshll.u32 %s398_s24, 4  ;;  %s218_s25 = int_to_ptr.vmem [resolvable:$true] %s217_s25 }
   0xd   :  { %198 = vmatpush.bf16.msra.mxu1 %v309_v1  ;;  %v307_v5 = vld [vmem:[#allocation5 + $0x68] sm:$0xff]  ;;  %v298_v6 = vld [vmem:[#allocation5 + $0x20] sm:$0xff]  ;;  %v297_v8 = vld [vmem:[#allocation5 + $0x18] sm:$0xff] }
   0xe   :  { %v306_v7 = vld [vmem:[#allocation5 + $0x60] sm:$0xff]  ;;  %v305_v9 = vld [vmem:[#allocation5 + $0x58] sm:$0xff]  ;;  %v296_v10 = vld [vmem:[#allocation5 + $0x10] sm:$0xff] }
   0xf   :  { %v304_v11 = vld [vmem:[#allocation5 + $0x50] sm:$0xff]  ;;  %v295_v12 = vld [vmem:[#allocation5 + $0x8] sm:$0xff]  ;;  %v45_v14 = vld [vmem:[#allocation2] sm:$0xff] }
  0x10   :  { %186 = vmatpush.bf16.msra.mxu0 %v300_v2  ;;  %v303_v13 = vld [vmem:[#allocation5 + $0x48] sm:$0xff]  ;;  %v83_v15 = vunpack.c.l.b16 %v45_v14  ;;  %v84_v16 = vunpack.c.h.b16 %v45_v14  ;;  %v294_v17 = vld [vmem:[#allocation5] sm:$0xff]  ;;  %v315_v21 = vld [vmem:[%s433_s2] ss:$0 sm:$0xff] }
  0x11   :  { %199 = vmatpush.bf16.msra.mxu1 %v308_v3  ;;  %v302_v18 = vld [vmem:[#allocation5 + $0x40] sm:$0xff] }
  0x12   :  { %v85_v19 = vpack.c.b16 %v83_v15, %v83_v15  ;;  %v86_v20 = vpack.c.b16 %v84_v16, %v84_v16 }
  0x14   :  { %187 = vmatpush.bf16.msra.mxu0 %v299_v4 }
  0x15   :  { %200 = vmatpush.bf16.msra.mxu1 %v307_v5 }
  0x18   :  { %188 = vmatpush.bf16.msra.mxu0 %v298_v6 }
  0x19   :  { %201 = vmatpush.bf16.msra.mxu1 %v306_v7 }
  0x1c   :  { %189 = vmatpush.bf16.msra.mxu0 %v297_v8 }
  0x1d   :  { %202 = vmatpush.bf16.msra.mxu1 %v305_v9 }
  0x20   :  { %190 = vmatpush.bf16.msra.mxu0 %v296_v10 }
  0x21   :  { %203 = vmatpush.bf16.msra.mxu1 %v304_v11 }
  0x24   :  { %191 = vmatpush.bf16.msra.mxu0 %v295_v12 }
  0x25   :  { %204 = vmatpush.bf16.msra.mxu1 %v303_v13 }
  0x28   :  { %192 = vmatpush.bf16.msra.mxu0 %v294_v17 }
  0x29   :  { %205 = vmatpush.bf16.msra.mxu1 %v302_v18 }
  0x2b   :  { %193 = vmatmul.bf16.vlgmr.msra.gmra.mxu0 %v85_v19 }
  0x2c   :  { %206 = vmatmul.bf16.vlgmr.msra.gmra.mxu1 %v86_v20 }
  0xa8   :  { %v194_v22 = vpop.f32.mrf.mxu0 }
  0xa9   :  { %v207_v23 = vpop.f32.mrf.mxu1  ;;  %v195_v24 = vadd.f32 %v315_v21, %v194_v22 }
  0xab   :  { %v208_v25 = vadd.f32 %v207_v23, %v195_v24 }
  0xad   :  { %211 = vst [vmem:[#allocation7] sm:$0xff] %v208_v25 }
  0xae   :  { %222 = dma.vmem_to_hbm [thread:$0]  %s218_s25, 128, %s220_s28, [#allocation4]  }
  0xb0   :  { %v196_v26 = vpop.f32.mrf.mxu0 }
  0xb1   :  { %v209_v27 = vpop.f32.mrf.mxu1 }
  0xb2   :  { %392 = dma.done.wait [#allocation4], 128  }
  0xb3   :  { %393 = vsyncadd [#allocation4], 4294967168 }
  0xb4   :  { %227 = vsyncpa [#allocation3], 1 }
  0xb5   :  { %228 = vsyncpa [#allocation6], 1 }
  0xb6   :  { %229 = vsyncpa [#allocation4], 1 }

</bundles_post_ra>
